<compile_context>
chip_gen: v7x
topology: tpu7x:2x2x1
jax: 0.10.0
libtpu: 0.0.40
codegen_flags: <defaults>
</compile_context>

<pallas_src>
import functools

import jax
import jax.numpy as jnp
import numpy as np
from jax.experimental import pallas as pl
from jax.experimental.pallas import tpu as pltpu

_MAX_BLOCK_B = 8


def _cdiv(a, b):
    return -(-a // b)


def _round_up(a, m):
    return _cdiv(a, m) * m


@functools.lru_cache(maxsize=None)
def _vmem_budgets():
    """(vmem_limit_bytes, in+out double-buffered block budget) per generation."""
    try:
        cap = pltpu.get_tpu_info().vmem_capacity_bytes
    except Exception:
        cap = 64 * 1024 * 1024                       # conservative fallback
    if cap >= 96 * 1024 * 1024:                      # v5e / v6e: 128 MiB VMEM
        return 96 * 1024 * 1024, 24 * 1024 * 1024
    return 48 * 1024 * 1024, 12 * 1024 * 1024        # v7x: 64 MiB per TensorCore


# ---------------------------------------------------------------------------
# In-kernel helpers (all stream 128-lane slabs; no whole-block temporaries)
# ---------------------------------------------------------------------------
def _masked_pool_image(x_ref, b, hw, base):
    """f32 sum over lanes of image `b` of the current tile, masking global
    columns >= hw (ragged boundary tile).  `base` is the tile's global column
    offset: a Python int (fused path; mask statically elided) or a traced
    scalar (tiled path).  Returns (C, 1) f32."""
    C, t = x_ref.shape[1], x_ref.shape[2]
    static_base = isinstance(base, int)
    s = jnp.zeros((C, 1), jnp.float32)
    off = 0
    while off < t:
        w = min(128, t - off)
        xs = x_ref[b, :, off:off + w].astype(jnp.float32)
        if not (static_base and base + off + w <= hw):
            lane = jax.lax.broadcasted_iota(jnp.int32, (C, w), 1)
            xs = jnp.where(base + off + lane < hw, xs, 0.0)
        s = s + jnp.sum(xs, axis=-1, keepdims=True)
        off += w
    return s


def _columns_to_matrix(cols):
    """Stack bb (C,1) f32 columns into (C, bb) using only VPU ops."""
    bb = len(cols)
    if bb == 1:
        return cols[0]
    C = cols[0].shape[0]
    lane = jax.lax.broadcasted_iota(jnp.int32, (C, bb), 1)
    out = jnp.zeros((C, bb), jnp.float32)
    for b, c in enumerate(cols):
        out = out + jnp.where(lane == b, c, 0.0)
    return out


def _matrix_column(mat, b):
    """Extract column b of a (C, bb) matrix as (C, 1) using only VPU ops."""
    if mat.shape[1] == 1:
        return mat
    lane = jax.lax.broadcasted_iota(jnp.int32, mat.shape, 1)
    return jnp.sum(jnp.where(lane == b, mat, 0.0), axis=-1, keepdims=True)


def _channel_excitation(avg_cols, w1_ref, b1_ref, w2_ref, b2_ref):
    """avg_cols: (C, bb) f32 -> sigmoid(W2 @ relu(W1 @ avg + b1) + b2): (C, bb)."""
    h1 = jnp.dot(w1_ref[...], avg_cols, preferred_element_type=jnp.float32) + b1_ref[...]
    h1 = jnp.maximum(h1, 0.0)
    h2 = jnp.dot(w2_ref[...], h1, preferred_element_type=jnp.float32) + b2_ref[...]
    return jax.nn.sigmoid(h2)


def _spatial_multiply_image(x_ref, o_ref, b, chn_col, wsp):
    """Per 128-lane slab: spa = sigmoid(wsp @ x); out = x * chn * spa."""
    t = x_ref.shape[2]
    off = 0
    while off < t:
        w = min(128, t - off)
        xs = x_ref[b, :, off:off + w].astype(jnp.float32)
        spa = jax.nn.sigmoid(jnp.dot(wsp, xs, preferred_element_type=jnp.float32))
        o_ref[b, :, off:off + w] = (xs * chn_col * spa).astype(o_ref.dtype)
        off += w


# ---------------------------------------------------------------------------
# Kernels
# ---------------------------------------------------------------------------
def _fused_kernel(x_ref, w1_ref, b1_ref, w2_ref, b2_ref, wsp_ref, o_ref, *, hw, inv_hw):
    """Single pass: the whole (unpadded) spatial plane is one block; x is read
    from HBM exactly once and streamed slab-by-slab inside VMEM."""
    bb = x_ref.shape[0]
    sums = [_masked_pool_image(x_ref, b, hw, 0) for b in range(bb)]
    avg = _columns_to_matrix(sums) * inv_hw                               # (C, bb)
    chn = _channel_excitation(avg, w1_ref, b1_ref, w2_ref, b2_ref)        # (C, bb)
    wsp = wsp_ref[...]
    for b in range(bb):
        _spatial_multiply_image(x_ref, o_ref, b, _matrix_column(chn, b), wsp)


def _pool_excite_kernel(x_ref, w1_ref, b1_ref, w2_ref, b2_ref, chn_ref, acc_ref,
                        *, hw, inv_hw):
    """Pass 1 (tiled): HW-tiled global-average pool + channel excitation.
    The ragged boundary tile is masked in-kernel."""
    k = pl.program_id(1)
    bb, t = x_ref.shape[0], x_ref.shape[2]

    @pl.when(k == 0)
    def _():
        acc_ref[...] = jnp.zeros_like(acc_ref)

    base = k * t
    for b in range(bb):
        acc_ref[b] += _masked_pool_image(x_ref, b, hw, base)

    @pl.when(k == pl.num_programs(1) - 1)
    def _():
        sums = [acc_ref[b] for b in range(bb)]
        avg = _columns_to_matrix(sums) * inv_hw                           # (C, bb)
        chn = _channel_excitation(avg, w1_ref, b1_ref, w2_ref, b2_ref)    # (C, bb)
        for b in range(bb):
            chn_ref[b] = _matrix_column(chn, b)


def _spatial_fuse_kernel(x_ref, chn_ref, wsp_ref, o_ref):
    """Pass 2 (tiled): spatial SE (1x1 conv on MXU) + fused x*chn*spa.
    OOB lanes of the boundary tile produce garbage only in OOB output lanes,
    which are discarded by the boundary-block writeback."""
    bb = x_ref.shape[0]
    wsp = wsp_ref[...]
    for b in range(bb):
        _spatial_multiply_image(x_ref, o_ref, b, chn_ref[b], wsp)


# ---------------------------------------------------------------------------
# Tiling selection
# ---------------------------------------------------------------------------
def _choose_tiling(B, C, HW, dsize, blk_budget, tile_hw, block_b):
    c_pad = _round_up(C, max(8, 32 // dsize))       # sublane packing (16 for bf16)
    hw_lanes = _round_up(HW, 128)

    # Fused (single-read) path: whole plane per image fits the block budget.
    if tile_hw is None and 4 * c_pad * hw_lanes * dsize <= blk_budget:
        if block_b is not None:
            bb = int(block_b)
        else:
            bb = 1
            cap = min(_MAX_BLOCK_B, max(1, B // 2))   # keep >=2 parallel grid steps
            for d in range(cap, 0, -1):
                if B % d == 0 and 4 * d * c_pad * hw_lanes * dsize <= blk_budget:
                    bb = d
                    break
        return True, bb, None, None, None, None

    bb = 1 if block_b is None else int(block_b)

    def _pick(buffers, forced):
        if forced is not None:
            t = _round_up(int(forced), 128)
        else:
            t = max(128, (blk_budget // (buffers * bb * c_pad * dsize)) // 128 * 128)
        t = min(t, hw_lanes)
        n = _cdiv(HW, t)
        t = min(_round_up(_cdiv(HW, n), 128), hw_lanes)   # rebalance ragged tail
        n = _cdiv(HW, t)
        if t >= HW:                                       # single full-extent tile
            t, n = HW, 1
        return t, n

    t2, n2 = _pick(4, tile_hw)          # pass 2: input + output double-buffered
    if tile_hw is not None:
        t1, n1 = t2, n2                 # honor explicit override in both passes
    else:
        t1, n1 = _pick(2, None)         # pass 1: only the input is double-buffered
    return False, bb, t1, n1, t2, n2


# ---------------------------------------------------------------------------
# Wrapper
# ---------------------------------------------------------------------------
@functools.partial(jax.jit, static_argnames=("tile_hw", "block_b"))
def modified_scse_block(x, w1, b1, w2, b2, w_sp, *, tile_hw=None, block_b=None):
    """x: (B, C, H, W) float32 or bfloat16.  Returns (B, C, H, W) in x.dtype."""
    B, C, H, W = x.shape
    HW = H * W
    Cr = w1.shape[0]
    dsize = jnp.dtype(x.dtype).itemsize
    vmem_limit, blk_budget = _vmem_budgets()

    fused, bb, t1, n1, t2, n2 = _choose_tiling(B, C, HW, dsize, blk_budget,
                                               tile_hw, block_b)
    assert B % bb == 0, "block_b must divide the batch size"
    grid_b = B // bb
    inv_hw = 1.0 / HW

    x_flat = x.reshape(B, C, HW)     # free reshape; NO padding copy

    w1_f = w1.astype(jnp.float32)
    w2_f = w2.astype(jnp.float32)
    b1_col = b1.reshape(Cr, 1).astype(jnp.float32)
    b2_col = b2.reshape(C, 1).astype(jnp.float32)
    wsp_row = w_sp.reshape(1, C).astype(jnp.float32)

    if fused:
        out_flat = pl.pallas_call(
            functools.partial(_fused_kernel, hw=HW, inv_hw=inv_hw),
            out_shape=jax.ShapeDtypeStruct((B, C, HW), x.dtype),
            grid_spec=pltpu.PrefetchScalarGridSpec(
                num_scalar_prefetch=0,
                grid=(grid_b,),
                in_specs=[
                    pl.BlockSpec((bb, C, HW), lambda b: (b, 0, 0)),
                    pl.BlockSpec((Cr, C), lambda b: (0, 0)),
                    pl.BlockSpec((Cr, 1), lambda b: (0, 0)),
                    pl.BlockSpec((C, Cr), lambda b: (0, 0)),
                    pl.BlockSpec((C, 1), lambda b: (0, 0)),
                    pl.BlockSpec((1, C), lambda b: (0, 0)),
                ],
                out_specs=pl.BlockSpec((bb, C, HW), lambda b: (b, 0, 0)),
            ),
            compiler_params=pltpu.CompilerParams(
                dimension_semantics=("parallel",),
                vmem_limit_bytes=vmem_limit),
            cost_estimate=pl.CostEstimate(
                flops=4 * B * C * HW,
                transcendentals=B * (HW + 2 * C),
                bytes_accessed=2 * B * C * HW * dsize),
        )(x_flat, w1_f, b1_col, w2_f, b2_col, wsp_row)
    else:
        # Pass 1: HW-tiled pool + channel excitation -> chn_se (B, C, 1) f32.
        chn = pl.pallas_call(
            functools.partial(_pool_excite_kernel, hw=HW, inv_hw=inv_hw),
            out_shape=jax.ShapeDtypeStruct((B, C, 1), jnp.float32),
            grid_spec=pltpu.PrefetchScalarGridSpec(
                num_scalar_prefetch=0,
                grid=(grid_b, n1),
                in_specs=[
                    pl.BlockSpec((bb, C, t1), lambda b, k: (b, 0, k)),
                    pl.BlockSpec((Cr, C), lambda b, k: (0, 0)),
                    pl.BlockSpec((Cr, 1), lambda b, k: (0, 0)),
                    pl.BlockSpec((C, Cr), lambda b, k: (0, 0)),
                    pl.BlockSpec((C, 1), lambda b, k: (0, 0)),
                ],
                out_specs=pl.BlockSpec((bb, C, 1), lambda b, k: (b, 0, 0)),
                scratch_shapes=[pltpu.VMEM((bb, C, 1), jnp.float32)],
            ),
            compiler_params=pltpu.CompilerParams(
                dimension_semantics=("parallel", "arbitrary"),
                vmem_limit_bytes=vmem_limit),
            cost_estimate=pl.CostEstimate(
                flops=B * C * HW,
                transcendentals=2 * B * C,
                bytes_accessed=B * C * HW * dsize),
        )(x_flat, w1_f, b1_col, w2_f, b2_col)

        # Pass 2: HW-tiled spatial SE + fused multiply.
        out_flat = pl.pallas_call(
            _spatial_fuse_kernel,
            out_shape=jax.ShapeDtypeStruct((B, C, HW), x.dtype),
            grid_spec=pltpu.PrefetchScalarGridSpec(
                num_scalar_prefetch=0,
                grid=(grid_b, n2),
                in_specs=[
                    pl.BlockSpec((bb, C, t2), lambda b, k: (b, 0, k)),
                    pl.BlockSpec((bb, C, 1), lambda b, k: (b, 0, 0)),
                    pl.BlockSpec((1, C), lambda b, k: (0, 0)),
                ],
                out_specs=pl.BlockSpec((bb, C, t2), lambda b, k: (b, 0, k)),
            ),
            compiler_params=pltpu.CompilerParams(
                dimension_semantics=("parallel", "parallel"),
                vmem_limit_bytes=vmem_limit),
            cost_estimate=pl.CostEstimate(
                flops=4 * B * C * HW,
                transcendentals=B * HW,
                bytes_accessed=2 * B * C * HW * dsize),
        )(x_flat, chn, wsp_row)

    return out_flat.reshape(B, C, H, W)


# ---------------------------------------------------------------------------
# Reference + tests
# ---------------------------------------------------------------------------
def _reference(x, w1, b1, w2, b2, w_sp):
    """Pure-JAX reference matching the PyTorch forward (compute in f32)."""
    B, C, H, W = x.shape
    xf = x.astype(jnp.float32)
    avg = jnp.mean(xf, axis=(2, 3))                                   # (B, C)
    h1 = jnp.maximum(avg @ w1.T + b1, 0.0)                            # (B, Cr)
    chn = jax.nn.sigmoid(h1 @ w2.T + b2)                              # (B, C)
    spa = jax.nn.sigmoid(jnp.einsum("c,bchw->bhw", w_sp.reshape(C), xf))
    return xf * chn[:, :, None, None] * spa[:, None, :, :]


if __name__ == "__main__":
    root = jax.random.PRNGKey(0)

    def make_params(key, C, reduction=2):
        Cr = max(1, C // reduction)
        k1, k2, k3, k4, k5 = jax.random.split(key, 5)
        w1 = jax.random.normal(k1, (Cr, C), jnp.float32) * 0.5   # Linear(C, Cr).weight
        b1 = jax.random.normal(k2, (Cr,), jnp.float32) * 0.1     # Linear(C, Cr).bias
        w2 = jax.random.normal(k3, (C, Cr), jnp.float32) * 0.5   # Linear(Cr, C).weight
        b2 = jax.random.normal(k4, (C,), jnp.float32) * 0.1      # Linear(Cr, C).bias
        w_sp = jax.random.normal(k5, (1, C, 1, 1), jnp.float32) * 0.5  # Conv2d(C,1,1)
        return w1, b1, w2, b2, w_sp

    k_a, k_b, k_c, k_pa, k_pb, k_pc = jax.random.split(root, 6)

    # Test 1: canonical small shape, f32 (fused single-pass path).
    B, C, H, W = 2, 4, 16, 16
    params_a = make_params(k_pa, C)
    x_a = jax.random.normal(k_a, (B, C, H, W), jnp.float32)
    out = jax.block_until_ready(modified_scse_block(x_a, *params_a))
    np.testing.assert_allclose(np.asarray(out), np.asarray(_reference(x_a, *params_a)),
                               rtol=1e-4, atol=1e-5)

    # Test 2: non-multiple-of-128 spatial size, fused path (full-extent block,
    # no wrapper-side padding).
    B, C, H, W = 3, 8, 12, 12          # HW = 144
    params_b = make_params(k_pb, C)
    x_b = jax.random.normal(k_b, (B, C, H, W), jnp.float32)
    out = jax.block_until_ready(modified_scse_block(x_b, *params_b))
    np.testing.assert_allclose(np.asarray(out), np.asarray(_reference(x_b, *params_b)),
                               rtol=1e-4, atol=1e-5)

    # Test 3: same shape, forced HW tiling (two-pass path, ragged boundary tile
    # -> exercises the in-kernel lane mask of the pool).
    out = jax.block_until_ready(modified_scse_block(x_b, *params_b, tile_hw=128))
    np.testing.assert_allclose(np.asarray(out), np.asarray(_reference(x_b, *params_b)),
                               rtol=1e-4, atol=1e-5)

    # Test 4: bigger batch -> multiple images per block (batched excitation MLP).
    B, C, H, W = 4, 4, 8, 8
    params_c = make_params(k_pc, C)
    x_c = jax.random.normal(k_c, (B, C, H, W), jnp.float32)
    out = jax.block_until_ready(modified_scse_block(x_c, *params_c))
    np.testing.assert_allclose(np.asarray(out), np.asarray(_reference(x_c, *params_c)),
                               rtol=1e-4, atol=1e-5)

    # Test 5: bf16 I/O on the fused path (compute stays in f32).
    x_a16 = x_a.astype(jnp.bfloat16)
    out = jax.block_until_ready(modified_scse_block(x_a16, *params_a))
    assert out.dtype == jnp.bfloat16
    np.testing.assert_allclose(np.asarray(out.astype(jnp.float32)),
                               np.asarray(_reference(x_a16, *params_a)),
                               rtol=1e-2, atol=1e-2)

    # Test 6: bf16 I/O on the tiled two-pass path with a ragged tail.
    x_b16 = x_b.astype(jnp.bfloat16)
    out = jax.block_until_ready(modified_scse_block(x_b16, *params_b, tile_hw=128))
    assert out.dtype == jnp.bfloat16
    np.testing.assert_allclose(np.asarray(out.astype(jnp.float32)),
                               np.asarray(_reference(x_b16, *params_b)),
                               rtol=1e-2, atol=1e-2)

    print("KERNEL_OK")
</pallas_src>

<mosaic_0001>
module attributes {stable_mosaic.version = 11 : i64} {
  func.func @_fused_kernel(%arg0: i32, %arg1: memref<1x4x256xf32, #tpu.memory_space<vmem>>, %arg2: memref<2x4xf32, #tpu.memory_space<vmem>>, %arg3: memref<2x1xf32, #tpu.memory_space<vmem>>, %arg4: memref<4x2xf32, #tpu.memory_space<vmem>>, %arg5: memref<4x1xf32, #tpu.memory_space<vmem>>, %arg6: memref<1x4xf32, #tpu.memory_space<vmem>>, %arg7: memref<1x4x256xf32, #tpu.memory_space<vmem>>) attributes {dimension_semantics = [#tpu.dimension_semantics<parallel>], iteration_bounds = array<i64: 2>, scalar_prefetch = 0 : i64, scratch_operands = 0 : i64, tpu.core_type = #tpu.core_type<tc>, window_params = [{transform_indices = @transform_0, window_bounds = array<i64: 1, 4, 256>}, {pipeline_mode = #tpu.pipeline_mode<synchronous>, transform_indices = @transform_1, window_bounds = array<i64: 2, 4>}, {pipeline_mode = #tpu.pipeline_mode<synchronous>, transform_indices = @transform_2, window_bounds = array<i64: 2, 1>}, {pipeline_mode = #tpu.pipeline_mode<synchronous>, transform_indices = @transform_3, window_bounds = array<i64: 4, 2>}, {pipeline_mode = #tpu.pipeline_mode<synchronous>, transform_indices = @transform_4, window_bounds = array<i64: 4, 1>}, {pipeline_mode = #tpu.pipeline_mode<synchronous>, transform_indices = @transform_5, window_bounds = array<i64: 1, 4>}, {transform_indices = @transform_6, window_bounds = array<i64: 1, 4, 256>}]} {
    %cst = arith.constant 0.000000e+00 : f32
    %0 = vector.broadcast %cst : f32 to vector<4x1xf32>
    %c0 = arith.constant 0 : index
    %c0_0 = arith.constant 0 : index
    %c0_1 = arith.constant 0 : index
    %1 = vector.load %arg1[%c0, %c0_0, %c0_1] : memref<1x4x256xf32, #tpu.memory_space<vmem>>, vector<1x4x128xf32>
    %2 = vector.shape_cast %1 : vector<1x4x128xf32> to vector<4x128xf32>
    %cst_2 = arith.constant dense<0.000000e+00> : vector<4xf32>
    %3 = vector.multi_reduction <add>, %2, %cst_2 [1] : vector<4x128xf32> to vector<4xf32>
    %4 = vector.shape_cast %3 : vector<4xf32> to vector<4x1xf32>
    %5 = arith.addf %0, %4 : vector<4x1xf32>
    %c0_3 = arith.constant 0 : index
    %c0_4 = arith.constant 0 : index
    %c128 = arith.constant 128 : index
    %6 = vector.load %arg1[%c0_3, %c0_4, %c128] : memref<1x4x256xf32, #tpu.memory_space<vmem>>, vector<1x4x128xf32>
    %7 = vector.shape_cast %6 : vector<1x4x128xf32> to vector<4x128xf32>
    %cst_5 = arith.constant dense<0.000000e+00> : vector<4xf32>
    %8 = vector.multi_reduction <add>, %7, %cst_5 [1] : vector<4x128xf32> to vector<4xf32>
    %9 = vector.shape_cast %8 : vector<4xf32> to vector<4x1xf32>
    %10 = arith.addf %5, %9 : vector<4x1xf32>
    %cst_6 = arith.constant 3.906250e-03 : f32
    %11 = vector.broadcast %cst_6 : f32 to vector<4x1xf32>
    %12 = arith.mulf %10, %11 : vector<4x1xf32>
    %c0_7 = arith.constant 0 : index
    %c0_8 = arith.constant 0 : index
    %13 = vector.load %arg2[%c0_7, %c0_8] : memref<2x4xf32, #tpu.memory_space<vmem>>, vector<2x4xf32>
    %cst_9 = arith.constant dense<0.000000e+00> : vector<2x1xf32>
    %14 = tpu.matmul %13, %12, %cst_9 {dimension_numbers = #tpu.dot_dimension_numbers<[1], [0], [0], [1], [0, 0, 1, 1], [], []>} : vector<2x4xf32>, vector<4x1xf32>, vector<2x1xf32> -> vector<2x1xf32>
    %c0_10 = arith.constant 0 : index
    %c0_11 = arith.constant 0 : index
    %15 = vector.load %arg3[%c0_10, %c0_11] : memref<2x1xf32, #tpu.memory_space<vmem>>, vector<2x1xf32>
    %16 = arith.addf %14, %15 : vector<2x1xf32>
    %cst_12 = arith.constant 0.000000e+00 : f32
    %17 = vector.broadcast %cst_12 : f32 to vector<2x1xf32>
    %18 = arith.maximumf %16, %17 : vector<2x1xf32>
    %c0_13 = arith.constant 0 : index
    %c0_14 = arith.constant 0 : index
    %19 = vector.load %arg4[%c0_13, %c0_14] : memref<4x2xf32, #tpu.memory_space<vmem>>, vector<4x2xf32>
    %cst_15 = arith.constant dense<0.000000e+00> : vector<4x1xf32>
    %20 = tpu.matmul %19, %18, %cst_15 {dimension_numbers = #tpu.dot_dimension_numbers<[1], [0], [0], [1], [0, 0, 1, 1], [], []>} : vector<4x2xf32>, vector<2x1xf32>, vector<4x1xf32> -> vector<4x1xf32>
    %c0_16 = arith.constant 0 : index
    %c0_17 = arith.constant 0 : index
    %21 = vector.load %arg5[%c0_16, %c0_17] : memref<4x1xf32, #tpu.memory_space<vmem>>, vector<4x1xf32>
    %22 = arith.addf %20, %21 : vector<4x1xf32>
    %23 = arith.negf %22 : vector<4x1xf32>
    %24 = math.exp %23 : vector<4x1xf32>
    %cst_18 = arith.constant 1.000000e+00 : f32
    %25 = vector.broadcast %cst_18 : f32 to vector<4x1xf32>
    %26 = arith.addf %25, %24 : vector<4x1xf32>
    %27 = arith.divf %25, %26 : vector<4x1xf32>
    %c0_19 = arith.constant 0 : index
    %c0_20 = arith.constant 0 : index
    %28 = vector.load %arg6[%c0_19, %c0_20] : memref<1x4xf32, #tpu.memory_space<vmem>>, vector<1x4xf32>
    %c0_21 = arith.constant 0 : index
    %c0_22 = arith.constant 0 : index
    %c0_23 = arith.constant 0 : index
    %29 = vector.load %arg1[%c0_21, %c0_22, %c0_23] : memref<1x4x256xf32, #tpu.memory_space<vmem>>, vector<1x4x128xf32>
    %30 = vector.shape_cast %29 : vector<1x4x128xf32> to vector<4x128xf32>
    %cst_24 = arith.constant dense<0.000000e+00> : vector<1x128xf32>
    %31 = tpu.matmul %28, %30, %cst_24 {dimension_numbers = #tpu.dot_dimension_numbers<[1], [0], [0], [1], [0, 0, 1, 1], [], []>} : vector<1x4xf32>, vector<4x128xf32>, vector<1x128xf32> -> vector<1x128xf32>
    %32 = arith.negf %31 : vector<1x128xf32>
    %33 = math.exp %32 : vector<1x128xf32>
    %cst_25 = arith.constant 1.000000e+00 : f32
    %34 = vector.broadcast %cst_25 : f32 to vector<1x128xf32>
    %35 = arith.addf %34, %33 : vector<1x128xf32>
    %36 = arith.divf %34, %35 : vector<1x128xf32>
    %37 = vector.broadcast %27 : vector<4x1xf32> to vector<4x128xf32>
    %38 = arith.mulf %30, %37 : vector<4x128xf32>
    %39 = vector.broadcast %36 : vector<1x128xf32> to vector<4x128xf32>
    %40 = arith.mulf %38, %39 : vector<4x128xf32>
    %c0_26 = arith.constant 0 : index
    %c0_27 = arith.constant 0 : index
    %c0_28 = arith.constant 0 : index
    %41 = vector.load %arg7[%c0_26, %c0_27, %c0_28] : memref<1x4x256xf32, #tpu.memory_space<vmem>>, vector<1x4x128xf32>
    %42 = vector.shape_cast %41 : vector<1x4x128xf32> to vector<4x128xf32>
    %43 = vector.shape_cast %40 : vector<4x128xf32> to vector<1x4x128xf32>
    tpu.vector_store %arg7[%c0_26, %c0_27, %c0_28], %43 {strides = array<i32>} : memref<1x4x256xf32, #tpu.memory_space<vmem>>, vector<1x4x128xf32>,
    %c0_29 = arith.constant 0 : index
    %c0_30 = arith.constant 0 : index
    %c128_31 = arith.constant 128 : index
    %44 = vector.load %arg1[%c0_29, %c0_30, %c128_31] : memref<1x4x256xf32, #tpu.memory_space<vmem>>, vector<1x4x128xf32>
    %45 = vector.shape_cast %44 : vector<1x4x128xf32> to vector<4x128xf32>
    %cst_32 = arith.constant dense<0.000000e+00> : vector<1x128xf32>
    %46 = tpu.matmul %28, %45, %cst_32 {dimension_numbers = #tpu.dot_dimension_numbers<[1], [0], [0], [1], [0, 0, 1, 1], [], []>} : vector<1x4xf32>, vector<4x128xf32>, vector<1x128xf32> -> vector<1x128xf32>
    %47 = arith.negf %46 : vector<1x128xf32>
    %48 = math.exp %47 : vector<1x128xf32>
    %cst_33 = arith.constant 1.000000e+00 : f32
    %49 = vector.broadcast %cst_33 : f32 to vector<1x128xf32>
    %50 = arith.addf %49, %48 : vector<1x128xf32>
    %51 = arith.divf %49, %50 : vector<1x128xf32>
    %52 = vector.broadcast %27 : vector<4x1xf32> to vector<4x128xf32>
    %53 = arith.mulf %45, %52 : vector<4x128xf32>
    %54 = vector.broadcast %51 : vector<1x128xf32> to vector<4x128xf32>
    %55 = arith.mulf %53, %54 : vector<4x128xf32>
    %c0_34 = arith.constant 0 : index
    %c0_35 = arith.constant 0 : index
    %c128_36 = arith.constant 128 : index
    %56 = vector.load %arg7[%c0_34, %c0_35, %c128_36] : memref<1x4x256xf32, #tpu.memory_space<vmem>>, vector<1x4x128xf32>
    %57 = vector.shape_cast %56 : vector<1x4x128xf32> to vector<4x128xf32>
    %58 = vector.shape_cast %55 : vector<4x128xf32> to vector<1x4x128xf32>
    tpu.vector_store %arg7[%c0_34, %c0_35, %c128_36], %58 {strides = array<i32>} : memref<1x4x256xf32, #tpu.memory_space<vmem>>, vector<1x4x128xf32>,
    return
  }
  func.func @transform_0(%arg0: i32) -> (i32, i32, i32) {
    %c0_i32 = arith.constant 0 : i32
    %c0_i32_0 = arith.constant 0 : i32
    %c0_i32_1 = arith.constant 0 : i32
    return %arg0, %c0_i32, %c0_i32_0 : i32, i32, i32
  }
  func.func @transform_1(%arg0: i32) -> (i32, i32) {
    %c0_i32 = arith.constant 0 : i32
    %c0_i32_0 = arith.constant 0 : i32
    %c0_i32_1 = arith.constant 0 : i32
    return %c0_i32, %c0_i32_0 : i32, i32
  }
  func.func @transform_2(%arg0: i32) -> (i32, i32) {
    %c0_i32 = arith.constant 0 : i32
    %c0_i32_0 = arith.constant 0 : i32
    %c0_i32_1 = arith.constant 0 : i32
    return %c0_i32, %c0_i32_0 : i32, i32
  }
  func.func @transform_3(%arg0: i32) -> (i32, i32) {
    %c0_i32 = arith.constant 0 : i32
    %c0_i32_0 = arith.constant 0 : i32
    %c0_i32_1 = arith.constant 0 : i32
    return %c0_i32, %c0_i32_0 : i32, i32
  }
  func.func @transform_4(%arg0: i32) -> (i32, i32) {
    %c0_i32 = arith.constant 0 : i32
    %c0_i32_0 = arith.constant 0 : i32
    %c0_i32_1 = arith.constant 0 : i32
    return %c0_i32, %c0_i32_0 : i32, i32
  }
  func.func @transform_5(%arg0: i32) -> (i32, i32) {
    %c0_i32 = arith.constant 0 : i32
    %c0_i32_0 = arith.constant 0 : i32
    %c0_i32_1 = arith.constant 0 : i32
    return %c0_i32, %c0_i32_0 : i32, i32
  }
  func.func @transform_6(%arg0: i32) -> (i32, i32, i32) {
    %c0_i32 = arith.constant 0 : i32
    %c0_i32_0 = arith.constant 0 : i32
    %c0_i32_1 = arith.constant 0 : i32
    return %arg0, %c0_i32, %c0_i32_0 : i32, i32, i32
  }
}

</mosaic_0001>

<bundles_post_ra>
// kernel: modified_scse_block.1
= control target key start
LH: loop header
LB: loop body
LE: loop exit
PB: predicated region body
PF: predicated region fallthrough
CT: control target
= control target key end

     0   :  { %s790_s21 = smov 0   ;;  %s851_s0 = inlined_call_operand.vmem [shape: f32[2,4,256], index: 0, kind: input, shape index: {}]   ;;  %s852_s1 = inlined_call_operand.vmem [shape: f32[2,4], index: 1, kind: input, shape index: {}]   ;;  %s853_s2 = inlined_call_operand.vmem [shape: f32[2,1], index: 2, kind: input, shape index: {}]   ;;  %s854_s3 = inlined_call_operand.vmem [shape: f32[4,2], index: 3, kind: input, shape index: {}]   ;;  %s855_s4 = inlined_call_operand.vmem [shape: f32[4,1], index: 4, kind: input, shape index: {}]   ;;  %s856_s5 = inlined_call_operand.vmem [shape: f32[1,4], index: 5, kind: input, shape index: {}]   ;;  %s857_s6 = inlined_call_operand.vmem [shape: f32[2,4,256], index: 6, kind: output, shape index: {}]  }
   0x1 LB: > { %s667_s22 = sadd.s32 4294967295, %s750_s21   ;;  %p671_p0 = scmp.ge.s32.totalorder %s750_s21, 1  ;;  %s750_s21 = sphi %s790_s21, %s16_s21  }
   0x2   : > { %p212_p1 = scmp.lt.s32.totalorder %s750_s21, 3 }
   0x4   : > { %p213_p2 = pnand %p671_p0, %p212_p1 }
   0x5   : > { %p242_p3 = scmp.lt.s32.totalorder (!%p213_p2), %s667_s22, 1  ;;  %vm253_vm0 = vcmask (!%p213_p2), 1043456   ;;  %v752_v4 = vmov (!%p213_p2), 0.0   ;;  %vm753_vm1 = vmmov (!%p213_p2), 0   ;;  %v264_v9 = vld [vmem:[%s852_s1] sm:$0x3] (!%p213_p2)  ;;  %v519_v37 = vlaneseq (!%p213_p2) }
   0x6   : > { %216 = sbr.rel (%p213_p2) target bundleno = 759 (0x2f7), region = 44  ;;  %699 = vmatprep.subr.mxu0 (!%p213_p2), %v752_v4  ;;  %704 = vmatprep.subr.mxu1 (!%p213_p2), %v752_v4  ;;  %vm266_vm2 = vcmask (!%p213_p2), 31744   ;;  %v430_v10 = vld [vmem:[%s856_s5] sm:$0x1] (!%p213_p2)  ;;  %vm350_vm3 = vcmask (!%p213_p2), 1041408   ;;  %vm346_vm4 = vcmask (!%p213_p2), 15360  }
   0x7   : > { %701 = vmatprep.mubr.msk.f32.mxu0 (!%p213_p2), %vm753_vm1, %v752_v4  ;;  %706 = vmatprep.mubr.msk.f32.mxu1 (!%p213_p2), %vm753_vm1, %v752_v4  ;;  %v265_v11 = vld [vmem:[%s853_s2] sm:$0x3] (!%p213_p2)  ;;  %v754_v18 = vmov (!%p213_p2), 0   ;;  %v520_v38 = vshrl.u32 (!%p213_p2), %v519_v37, 7 }
   0x8   : > { %v344_v16 = vld [vmem:[%s854_s3] sm:$0xf] (!%p213_p2)  ;;  %730 = vset.pattern.permute.xlu1 (!%p213_p2), %v754_v18  ;;  %731 = vset.pattern.permute.xlu0 (!%p213_p2), %v754_v18 }
   0x9   : > { %v345_v21 = vld [vmem:[%s855_s4] sm:$0xf] (!%p213_p2)  ;;  %v521_v40 = vsub.s32 (!%p213_p2), 0, %v520_v38 }
   0xd   : > { %s859_s22 = smov (!%p242_p3, %s667_s22), 1 }
   0xe   : > { %s689_s23 = sshll.u32 %s859_s22, 3 }
   0xf   : > { %s806_s26 = scalar_lea.vmem %s851_s0, %s689_s23  ;;  %s251_s15 = scalar_lea.vmem %s857_s6, %s689_s23 }
  0x10   : > { %v809_v0 = vld [vmem:[%s806_s26] sm:$0xf]  ;;  %v258_v1 = vld [vmem:[%s806_s26 + $0x4] sm:$0xf] }
  0x11   : > { %v254_v2 = vsel %vm253_vm0, %v809_v0, 0.0  ;;  %v259_v3 = vsel %vm253_vm0, %v258_v1, 0.0  ;;  %v525_v17 = vld [vmem:[%s806_s26 + $0x4] sm:$0xf] }
  0x12   : > { %255 = vadd.xlane.f32.xlu0 %v254_v2 }
  0x16   : > { %260 = vadd.xlane.f32.xlu0 %v259_v3 }
  0x9f   : > { %v256_v5 = vpop.xlane.xlu0 %255 }
  0xa3   : > { %v261_v6 = vpop.xlane.xlu0 %260 }
  0xa4   : > { %v262_v7 = vadd.f32 %v261_v6, %v256_v5 }
  0xa6   : > { %v263_v8 = vmul.f32 0.00390625, %v262_v7 }
  0xa8   : > { %700 = vmatpush3.msk.msra.mxu0 %vm253_vm0, %v263_v8 }
  0xa9   : > { %702 = vmatmul.mubr.msk.f32.vlgmr.msra.gmra.mrb[0].mxu0 %vm266_vm2, %v264_v9  ;;  %709 = vmatprep.subr.mxu0 %v752_v4 }
  0xaa   : > { %710 = vmatpush3.msk.msra.mxu0 %vm253_vm0, %v809_v0  ;;  %711 = vmatprep.mubr.msk.f32.mxu0 %vm753_vm1, %v752_v4 }
  0xad   : > { %712 = vmatmul.mubr.msk.f32.vlgmr.msra.gmra.mrb[2].mxu0 %vm266_vm2, %v430_v10 }
 0x17c   : > { %v339_v12 = vpop.f32.mrb[0].mxu0 }
 0x17d   : > { %v340_v13 = vadd.f32 %v339_v12, %v265_v11  ;;  %v703_v14 = vpop.f32.mrb[1].mxu0 }
 0x17f   : > { %v343_v15 = vmax.f32 %v340_v13, 0.0 }
 0x180   : > { %v503_v19 = vpop.f32.mrb[2].mxu0 }
 0x181   : > { %705 = vmatpush3.msk.msra.mxu1 %vm350_vm3, %v343_v15  ;;  %v713_v20 = vpop.f32.mrb[3].mxu0  ;;  %v683_v31 = vmul.f32 -1.442695, %v503_v19 }
 0x182   : > { %707 = vmatmul.mubr.msk.f32.vlgmr.msra.gmra.mrb[0].mxu1 %vm346_vm4, %v344_v16  ;;  %714 = vmatprep.subr.mxu1 %v752_v4 }
 0x183   : > { %715 = vmatpush3.msk.msra.mxu1 %vm253_vm0, %v525_v17  ;;  %716 = vmatprep.mubr.msk.f32.mxu1 %vm753_vm1, %v752_v4 }
 0x186   : > { %717 = vmatmul.mubr.msk.f32.vlgmr.msra.gmra.mrb[2].mxu1 %vm266_vm2, %v430_v10 }
 0x255   : > { %v420_v22 = vpop.f32.mrb[0].mxu1 }
 0x256   : > { %v421_v23 = vadd.f32 %v420_v22, %v345_v21  ;;  %v708_v24 = vpop.f32.mrb[1].mxu1 }
 0x258   : > { %v680_v25 = vmul.f32 -1.442695, %v421_v23 }
 0x259   : > { %v595_v26 = vpop.f32.mrb[2].mxu1 }
 0x25a   : > { %732 = vpow2.f32 %v680_v25  ;;  %v718_v27 = vpop.f32.mrb[3].mxu1  ;;  %v686_v32 = vmul.f32 -1.442695, %v595_v26 }
 0x264   : > { %v733_v28 = vpop.eup %732 }
 0x265   : > { %v427_v29 = vadd.f32 1.0, %v733_v28 }
 0x267   : > { %734 = vrcp.f32 %v427_v29 }
 0x268   : > { %736 = vpow2.f32 %v683_v31 }
 0x269   : > { %738 = vpow2.f32 %v686_v32 }
 0x271   : > { %v735_v30 = vpop.eup %734 }
 0x272   : > { %515 = vperm.xlu1 %730, %v735_v30   ;;  %v737_v33 = vpop.eup %736 }
 0x273   : > { %v739_v34 = vpop.eup %738  ;;  %v510_v35 = vadd.f32 1.0, %v737_v33 }
 0x274   : > { %v602_v36 = vadd.f32 1.0, %v739_v34 }
 0x275   : > { %740 = vrcp.f32 %v510_v35 }
 0x276   : > { %742 = vrcp.f32 %v602_v36 }
 0x27f   : > { %v741_v39 = vpop.eup %740 }
 0x280   : > { %v743_v41 = vpop.eup %742  ;;  %v522_v42 = vrot.slane %v741_v39, %v521_v40 }
 0x281   : > { %v609_v43 = vrot.slane %v743_v41, %v521_v40 }
 0x2f1   : > { %v516_v44 = vpop.permute.xlu1 %515 }
 0x2f2   : > { %v518_v45 = vmul.f32 %v516_v44, %v809_v0  ;;  %v605_v46 = vmul.f32 %v525_v17, %v516_v44 }
 0x2f4   : > { %v523_v47 = vmul.f32 %v522_v42, %v518_v45  ;;  %v610_v48 = vmul.f32 %v609_v43, %v605_v46 }
 0x2f6   : > { %524 = vst [vmem:[%s251_s15] sm:$0xf] %v523_v47  ;;  %611 = vst [vmem:[%s251_s15 + $0x4] sm:$0xf] %v610_v48 }
 0x2f7 PF: > { %s16_s21 = sadd.s32 1, %s750_s21  }
 0x2f8   : > { %p13_p4 = scmp.ge.s32.totalorder %s16_s21, 4  }
 0x2fa   :  { %15 = sbr.rel (!%p13_p4) target bundleno = 1 (0x1), region = 74 }

</bundles_post_ra>
